<compile_context>
chip_gen: v6e
topology: v6e:2x2x1
jax: 0.10.0
libtpu: 0.0.40
codegen_flags: <defaults>
</compile_context>

<pallas_src>
import jax
import jax.numpy as jnp
from jax import lax
from jax.experimental import pallas as pl
from jax.experimental.pallas import tpu as pltpu


def _bilinear_matrix(n_in, n_out):
    """(n_out, n_in) interpolation matrix for align_corners=True bilinear resize (1 axis)."""
    denom = max(n_out - 1, 1)
    src = jnp.arange(n_out, dtype=jnp.float32) * (n_in - 1) / denom
    i0 = jnp.clip(jnp.floor(src).astype(jnp.int32), 0, n_in - 1)
    i1 = jnp.clip(i0 + 1, 0, n_in - 1)
    frac = src - i0.astype(jnp.float32)
    rows = jnp.arange(n_out)
    m = jnp.zeros((n_out, n_in), jnp.float32)
    m = m.at[rows, i0].add(1.0 - frac)
    m = m.at[rows, i1].add(frac)
    return m


def upscaler_forward(x_nchw, w_oihw, gamma, beta, run_mean, run_var, eps=1e-5, scale=2):
    N, Cin, H, W = x_nchw.shape
    Cout = w_oihw.shape[0]
    Ho, Wo = H * scale, W * scale
    HW = H * W

    # -------- host-side (plain JAX) operand prep --------------------------------------------
    x = x_nchw.astype(jnp.float32)

    # im2col hoisted out of the kernel: zero-pad spatially, take 9 shifted views, flatten
    # spatial onto the lane axis.  Row ordering = (dy*3+dx)*Cin + cin, matching the weight
    # reshape below.  (N, 9*Cin, HW) bf16.
    xpad = jnp.pad(x, ((0, 0), (0, 0), (1, 1), (1, 1)))
    taps = []
    for dy in range(3):
        for dx in range(3):
            taps.append(xpad[:, :, dy:dy + H, dx:dx + W].reshape(N, Cin, HW))
    cols = jnp.concatenate(taps, axis=1).astype(jnp.bfloat16)              # (N, 9*Cin, HW)

    # Conv weights: (Cout, Cin, 3, 3) -> (Cout, 3, 3, Cin) -> (Cout, 9*Cin), bf16.
    # BN scale is NOT folded into the bf16 weights (accuracy); applied in f32 in the epilogue.
    w2 = jnp.transpose(w_oihw.astype(jnp.float32), (0, 2, 3, 1)).reshape(Cout, 9 * Cin)
    w2 = w2.astype(jnp.bfloat16)

    inv_std = 1.0 / jnp.sqrt(run_var.astype(jnp.float32) + eps)
    s = (gamma.astype(jnp.float32) * inv_std).reshape(Cout, 1)             # (Cout, 1) f32
    bias = (beta.astype(jnp.float32).reshape(Cout, 1)
            - run_mean.astype(jnp.float32).reshape(Cout, 1) * s)           # (Cout, 1) f32

    # Dense bilinear upsample operator: out = y @ kron(Uh, Uw)^T, (HW, Ho*Wo) bf16.
    Uh = _bilinear_matrix(H, Ho)                                           # (Ho, H)
    Uw = _bilinear_matrix(W, Wo)                                           # (Wo, W)
    Ut = jnp.kron(Uh, Uw).T.astype(jnp.bfloat16)                           # (HW, Ho*Wo)

    # -------- Pallas kernel -------------------------------------------------------------------
    def kernel(cols_ref, w_ref, s_ref, bias_ref, u_ref, o_ref):
        # Fused 3x3 conv: one K=9*Cin bf16 MXU matmul, f32 accumulation.
        acc = jnp.dot(w_ref[...], cols_ref[0],
                      preferred_element_type=jnp.float32)                  # (Cout, HW) f32

        # BatchNorm (inference) scale+bias in f32, then LeakyReLU(0.1) on the VPU.
        y = acc * s_ref[...] + bias_ref[...]
        y = jnp.maximum(y, 0.1 * y)

        # Bilinear x2 upsample (align_corners=True) as ONE dense bf16 MXU matmul producing the
        # lane-dense (Cout, Ho*Wo) output slab directly.
        out = jnp.dot(y.astype(jnp.bfloat16), u_ref[...],
                      preferred_element_type=jnp.float32)                  # (Cout, Ho*Wo) f32

        o_ref[0] = out.astype(o_ref.dtype)

    out = pl.pallas_call(
        kernel,
        out_shape=jax.ShapeDtypeStruct((N, Cout, Ho * Wo), jnp.float32),
        grid=(N,),
        in_specs=[
            pl.BlockSpec((1, 9 * Cin, HW), lambda n: (n, 0, 0)),
            pl.BlockSpec((Cout, 9 * Cin), lambda n: (0, 0)),
            pl.BlockSpec((Cout, 1), lambda n: (0, 0)),
            pl.BlockSpec((Cout, 1), lambda n: (0, 0)),
            pl.BlockSpec((HW, Ho * Wo), lambda n: (0, 0)),
        ],
        out_specs=pl.BlockSpec((1, Cout, Ho * Wo), lambda n: (n, 0, 0)),
        compiler_params=pltpu.CompilerParams(dimension_semantics=("parallel",)),
    )(cols, w2, s, bias, Ut)

    # Lane-dense slab -> PyTorch NCHW (pure reshape, no transpose needed).
    return out.reshape(N, Cout, Ho, Wo)


def _reference(x_nchw, w_oihw, gamma, beta, run_mean, run_var, eps=1e-5, scale=2):
    """Pure-JAX f32 reference for a numerical sanity check."""
    N, Cin, H, W = x_nchw.shape
    Ho, Wo = H * scale, W * scale
    x = jnp.transpose(x_nchw, (0, 2, 3, 1)).astype(jnp.float32)
    w_hwio = jnp.transpose(w_oihw, (2, 3, 1, 0)).astype(jnp.float32)
    conv = lax.conv_general_dilated(
        x, w_hwio, window_strides=(1, 1), padding="SAME",
        dimension_numbers=("NHWC", "HWIO", "NHWC"))
    inv_std = 1.0 / jnp.sqrt(run_var + eps)
    y = conv * (gamma * inv_std) + (beta - run_mean * gamma * inv_std)
    y = jnp.where(y >= 0, y, 0.1 * y)
    Uh = _bilinear_matrix(H, Ho)
    Uw = _bilinear_matrix(W, Wo)
    up = jnp.einsum("ih,nhwc->niwc", Uh, y)
    up = jnp.einsum("jw,niwc->nijc", Uw, up)
    return jnp.transpose(up, (0, 3, 1, 2))


if __name__ == "__main__":
    # Small shapes consistent with the module: N=2, inplanes=4, outplanes=8, H=W=16, scale=2.
    N, Cin, Cout, H, W = 2, 4, 8, 16, 16
    key = jax.random.PRNGKey(0)
    kx, kw, kg, kb, km, kv = jax.random.split(key, 6)

    x = jax.random.normal(kx, (N, Cin, H, W), jnp.float32)                 # NCHW, like PyTorch
    w = jax.random.normal(kw, (Cout, Cin, 3, 3), jnp.float32) * 0.1        # Conv2d weight
    gamma = 1.0 + 0.1 * jax.random.normal(kg, (Cout,), jnp.float32)        # BN weight
    beta = 0.1 * jax.random.normal(kb, (Cout,), jnp.float32)               # BN bias
    run_mean = 0.1 * jax.random.normal(km, (Cout,), jnp.float32)           # BN running_mean
    run_var = jnp.abs(1.0 + 0.1 * jax.random.normal(kv, (Cout,), jnp.float32))  # BN running_var

    out = upscaler_forward(x, w, gamma, beta, run_mean, run_var, scale=2)
    out = jax.block_until_ready(out)
    assert out.shape == (N, Cout, H * 2, W * 2)

    ref = jax.block_until_ready(_reference(x, w, gamma, beta, run_mean, run_var, scale=2))
    # bf16 MXU operands (f32 accumulation) -> compare with a bf16-appropriate tolerance.
    err = float(jnp.max(jnp.abs(out - ref)))
    assert jnp.allclose(out, ref, atol=2e-2, rtol=2e-2), err

    print("KERNEL_OK")
</pallas_src>

<mosaic_0001>
module attributes {stable_mosaic.version = 11 : i64} {
  func.func @kernel(%arg0: i32, %arg1: memref<1x36x256xbf16, #tpu.memory_space<vmem>>, %arg2: memref<8x36xbf16, #tpu.memory_space<vmem>>, %arg3: memref<8x1xf32, #tpu.memory_space<vmem>>, %arg4: memref<8x1xf32, #tpu.memory_space<vmem>>, %arg5: memref<256x1024xbf16, #tpu.memory_space<vmem>>, %arg6: memref<1x8x1024xf32, #tpu.memory_space<vmem>>) attributes {dimension_semantics = [#tpu.dimension_semantics<parallel>], iteration_bounds = array<i64: 2>, scalar_prefetch = 0 : i64, scratch_operands = 0 : i64, tpu.core_type = #tpu.core_type<tc>, window_params = [{transform_indices = @transform_0, window_bounds = array<i64: 1, 36, 256>}, {pipeline_mode = #tpu.pipeline_mode<synchronous>, transform_indices = @transform_1, window_bounds = array<i64: 8, 36>}, {pipeline_mode = #tpu.pipeline_mode<synchronous>, transform_indices = @transform_2, window_bounds = array<i64: 8, 1>}, {pipeline_mode = #tpu.pipeline_mode<synchronous>, transform_indices = @transform_3, window_bounds = array<i64: 8, 1>}, {pipeline_mode = #tpu.pipeline_mode<synchronous>, transform_indices = @transform_4, window_bounds = array<i64: 256, 1024>}, {transform_indices = @transform_5, window_bounds = array<i64: 1, 8, 1024>}]} {
    %c0 = arith.constant 0 : index
    %c0_0 = arith.constant 0 : index
    %0 = vector.load %arg2[%c0, %c0_0] : memref<8x36xbf16, #tpu.memory_space<vmem>>, vector<8x36xbf16>
    %c0_1 = arith.constant 0 : index
    %c0_2 = arith.constant 0 : index
    %c0_3 = arith.constant 0 : index
    %1 = vector.load %arg1[%c0_1, %c0_2, %c0_3] : memref<1x36x256xbf16, #tpu.memory_space<vmem>>, vector<1x36x256xbf16>
    %2 = vector.shape_cast %1 : vector<1x36x256xbf16> to vector<36x256xbf16>
    %cst = arith.constant dense<0.000000e+00> : vector<8x256xf32>
    %3 = tpu.matmul %0, %2, %cst {dimension_numbers = #tpu.dot_dimension_numbers<[1], [0], [0], [1], [0, 0, 1, 1], [], []>} : vector<8x36xbf16>, vector<36x256xbf16>, vector<8x256xf32> -> vector<8x256xf32>
    %c0_4 = arith.constant 0 : index
    %c0_5 = arith.constant 0 : index
    %4 = vector.load %arg3[%c0_4, %c0_5] : memref<8x1xf32, #tpu.memory_space<vmem>>, vector<8x1xf32>
    %5 = vector.broadcast %4 : vector<8x1xf32> to vector<8x256xf32>
    %6 = arith.mulf %3, %5 : vector<8x256xf32>
    %c0_6 = arith.constant 0 : index
    %c0_7 = arith.constant 0 : index
    %7 = vector.load %arg4[%c0_6, %c0_7] : memref<8x1xf32, #tpu.memory_space<vmem>>, vector<8x1xf32>
    %8 = vector.broadcast %7 : vector<8x1xf32> to vector<8x256xf32>
    %9 = arith.addf %6, %8 : vector<8x256xf32>
    %cst_8 = arith.constant 1.000000e-01 : f32
    %10 = vector.broadcast %cst_8 : f32 to vector<8x256xf32>
    %11 = arith.mulf %10, %9 : vector<8x256xf32>
    %12 = arith.maximumf %9, %11 : vector<8x256xf32>
    %13 = arith.truncf %12 : vector<8x256xf32> to vector<8x256xbf16>
    %c0_9 = arith.constant 0 : index
    %c0_10 = arith.constant 0 : index
    %14 = vector.load %arg5[%c0_9, %c0_10] : memref<256x1024xbf16, #tpu.memory_space<vmem>>, vector<256x1024xbf16>
    %cst_11 = arith.constant dense<0.000000e+00> : vector<8x1024xf32>
    %15 = tpu.matmul %13, %14, %cst_11 {dimension_numbers = #tpu.dot_dimension_numbers<[1], [0], [0], [1], [0, 0, 1, 1], [], []>} : vector<8x256xbf16>, vector<256x1024xbf16>, vector<8x1024xf32> -> vector<8x1024xf32>
    %c0_12 = arith.constant 0 : index
    %c0_13 = arith.constant 0 : index
    %c0_14 = arith.constant 0 : index
    %16 = vector.load %arg6[%c0_12, %c0_13, %c0_14] : memref<1x8x1024xf32, #tpu.memory_space<vmem>>, vector<1x8x1024xf32>
    %17 = vector.shape_cast %16 : vector<1x8x1024xf32> to vector<8x1024xf32>
    %18 = vector.shape_cast %15 : vector<8x1024xf32> to vector<1x8x1024xf32>
    tpu.vector_store %arg6[%c0_12, %c0_13, %c0_14], %18 {strides = array<i32>} : memref<1x8x1024xf32, #tpu.memory_space<vmem>>, vector<1x8x1024xf32>,
    return
  }
  func.func @transform_0(%arg0: i32) -> (i32, i32, i32) {
    %c0_i32 = arith.constant 0 : i32
    %c0_i32_0 = arith.constant 0 : i32
    %c0_i32_1 = arith.constant 0 : i32
    return %arg0, %c0_i32, %c0_i32_0 : i32, i32, i32
  }
  func.func @transform_1(%arg0: i32) -> (i32, i32) {
    %c0_i32 = arith.constant 0 : i32
    %c0_i32_0 = arith.constant 0 : i32
    %c0_i32_1 = arith.constant 0 : i32
    return %c0_i32, %c0_i32_0 : i32, i32
  }
  func.func @transform_2(%arg0: i32) -> (i32, i32) {
    %c0_i32 = arith.constant 0 : i32
    %c0_i32_0 = arith.constant 0 : i32
    %c0_i32_1 = arith.constant 0 : i32
    return %c0_i32, %c0_i32_0 : i32, i32
  }
  func.func @transform_3(%arg0: i32) -> (i32, i32) {
    %c0_i32 = arith.constant 0 : i32
    %c0_i32_0 = arith.constant 0 : i32
    %c0_i32_1 = arith.constant 0 : i32
    return %c0_i32, %c0_i32_0 : i32, i32
  }
  func.func @transform_4(%arg0: i32) -> (i32, i32) {
    %c0_i32 = arith.constant 0 : i32
    %c0_i32_0 = arith.constant 0 : i32
    %c0_i32_1 = arith.constant 0 : i32
    return %c0_i32, %c0_i32_0 : i32, i32
  }
  func.func @transform_5(%arg0: i32) -> (i32, i32, i32) {
    %c0_i32 = arith.constant 0 : i32
    %c0_i32_0 = arith.constant 0 : i32
    %c0_i32_1 = arith.constant 0 : i32
    return %arg0, %c0_i32, %c0_i32_0 : i32, i32, i32
  }
}

</mosaic_0001>

<bundles_post_ra>
// kernel: tpu_custom_call.1
= control target key start
LH: loop header
LB: loop body
LE: loop exit
PB: predicated region body
PF: predicated region fallthrough
CT: control target
= control target key end

     0   :  { %10 = vsyncpa [#allocation3], 0  ;;  %s1842_s0 = inlined_call_operand.vmem [shape: bf16[2,36,256], index: 0, kind: input, shape index: {}]   ;;  %s1843_s1 = inlined_call_operand.vmem [shape: bf16[8,36], index: 1, kind: input, shape index: {}]   ;;  %s1844_s2 = inlined_call_operand.vmem [shape: f32[8,1], index: 2, kind: input, shape index: {}]   ;;  %s1845_s3 = inlined_call_operand.vmem [shape: f32[8,1], index: 3, kind: input, shape index: {}]   ;;  %s1846_s4 = inlined_call_operand.hbm [shape: bf16[256,1024], index: 4, kind: input, shape index: {}]   ;;  %s1847_s5 = inlined_call_operand.hbm [shape: f32[2,8,1024], index: 5, kind: output, shape index: {}]  }
   0x1   :  { %11 = vsyncpa [#allocation4], 0 }
   0x2   :  { %13 = vsyncpa [#allocation4 + $0x1], 0  ;;  %s1710_s18 = smov 0   ;;  %s1712_s19 = smov 0  }
   0x3   :  { %s1714_s20 = smov 0   ;;  %s1716_s21 = smov 0  }
   0x4 LB: > { %s1731_s22 = sadd.s32 4294967295, %s1673_s21   ;;  %s1370_s23 = sadd.s32 4294967294, %s1673_s21   ;;  %s1673_s21 = sphi %s1716_s21, %s1855_s21   ;;  %s1669_s20 = sphi %s1714_s20, %s1854_s20   ;;  %s1665_s19 = sphi %s1712_s19, %s1853_s19   ;;  %s1661_s18 = sphi %s1710_s18, %s1852_s18  }
   0x5   : > { %s1735_s24 = sadd.s32 1, %s1673_s21   ;;  %s136_s25 = sadd.s32 1, %s1669_s20 }
   0x6   : > { %s133_s26 = ssub.s32 %s1673_s21, %s1735_s24  ;;  %p146_p0 = scmp.ne.s32.totalorder %s1669_s20, %s1665_s19 }
   0x7   : > { %p134_p1 = scmp.eq.s32.totalorder %s133_s26, 0  ;;  %p147_p2 = scmp.eq.s32.totalorder %s1731_s22, 1 }
   0x8   : > { %p152_p3 = scmp.ne.s32.totalorder %s1665_s19, %s1661_s18  ;;  %p153_p4 = scmp.eq.s32.totalorder %s1370_s23, 1 }
   0x9   : > { %s1746_s27 = scalar_select %p134_p1, %s1669_s20, %s136_s25  }
   0xa   : > { %p1748_p5 = por %p147_p2, %p146_p0  ;;  %p1752_p6 = por %p153_p4, %p152_p3 }
   0xb   : > { %p1371_p7 = scmp.ge.s32.totalorder %s1673_s21, 1  ;;  %p160_p8 = scmp.lt.s32.totalorder %s1673_s21, 3 }
   0xc   : > { %s1849_s29 = scalar_select %p1752_p6, 1, 0 }
   0xd   : > { %p1535_p9 = scmp.eq.s32.totalorder %s1731_s22, 0  ;;  %p1759_p10 = pnand %p1371_p7, %p160_p8 }
   0xe   : > { %s1675_s6 = smov [#allocation2]  }
   0xf   : > { %s181_s7 = sshll.u32 %s1675_s6, 4  ;;  %p1527_p11 = pneg %p1759_p10  ;;  %s182_s7 = int_to_ptr.vmem [resolvable:$true] %s181_s7 }
  0x10   : > { %s1594_s8 = scalar_lea.vmem %s182_s7, 16384  ;;  %p1602_p3 = scmp.lt.s32.totalorder %s182_s7, %s182_s7 }
  0x11   : > { %p1528_p12 = pnand %p1535_p9, %p1527_p11  ;;  %p1595_p0 = scmp.ne.s32.totalorder %s182_s7, %s1594_s8 }
  0x12   : > { %p1603_p4 = scmp.lt.s32.totalorder %s1594_s8, %s1594_s8 }
  0x13   : > { %p1585_p13 = pneg %p1528_p12 }
  0x14   : > { %p1604_p6 = por %p1603_p4, %p1602_p3 }
  0x15   : > { %p1597_p1 = pnand %p1595_p0, %p1585_p13 }
  0x17   : > { %p1598_p2 = pneg %p1597_p1 }
  0x19   : > { %p1605_p7 = pnand %p1604_p6, %p1598_p2 }
  0x1b   : > { %1608 = shalt.err (!%p1605_p7)
}
  0x1c   : > { %s1676_s9 = smov 512   ;;  %s1677_s10 = smov 32  }
  0x1d   : > { %1530 = dma.hbm_to_vmem [thread:$0]  (!%p1528_p12), %s1846_s4, 16384, %s182_s7, [#allocation3], %s1676_s9, %s1676_s9, %s1677_s10  }
  0x1e   : > { %205 = sbr.rel (%p1759_p10) target bundleno = 537 (0x219), region = 40 }
  0x23   : > { %1652 = dma.done.wait (%p1535_p9), [#allocation3], 16384  }
  0x24   : > { %1654 = vsyncadd (%p1535_p9), [#allocation3], 4294950912  ;;  %p233_p8 = scmp.lt.s32.totalorder %s1731_s22, 1  ;;  %v1678_v0 = vmov 0   ;;  %vm274_vm0 = vcmask 1041408   ;;  %v322_v7 = vld [vmem:[%s1844_s2] sm:$0xff] }
  0x25   : > { %313 = vmatprep.mubr.bf16.mxu0 %v1678_v0  ;;  %1574 = vset.pattern.permute.xlu0 %v1678_v0  ;;  %v400_v9 = vld [vmem:[#allocation2 + $0x1c0] sm:$0xff]  ;;  %v401_v16 = vld [vmem:[#allocation2 + $0x1c8] sm:$0xff]  ;;  %vm270_vm1 = vcmask 293888   ;;  %s230_s8 = sand.u32 1, %s1665_s19   ;;  %s1519_s11 = sshll.u32 %s1731_s22, 10 }
  0x26   : > { %s234_s13 = scalar_select %p233_p8, %s1731_s22, 1  ;;  %325 = vperm.xlu0 %1574, %v322_v7   ;;  %v404_v10 = vld [vmem:[#allocation2 + $0x1e0] sm:$0xff]  ;;  %v405_v17 = vld [vmem:[#allocation2 + $0x1e8] sm:$0xff] }
  0x27   : > { %v330_v11 = vld [vmem:[%s1845_s3] sm:$0xff]  ;;  %v1443_v12 = vcombine.high %v400_v9, %v404_v10  ;;  %v1442_v13 = vcombine.low %v400_v9, %v404_v10  ;;  %v1445_v22 = vcombine.high %v401_v16, %v405_v17  ;;  %v393_v24 = vld [vmem:[#allocation2 + $0x188] sm:$0xff]  ;;  %v1444_v30 = vcombine.low %v401_v16, %v405_v17  ;;  %s1376_s9 = sshll.u32 %s230_s8, 6  ;;  %s1801_s15 = scalar_lea.hbm %s1847_s5, %s1519_s11 }
  0x28   : > { %s1520_s14 = smul.u32 40, %s234_s13  ;;  %v392_v14 = vld [vmem:[#allocation2 + $0x180] sm:$0xff]  ;;  %v397_v25 = vld [vmem:[#allocation2 + $0x1a8] sm:$0xff]  ;;  %s232_s10 = scalar_lea.vmem [#allocation5], %s1376_s9 }
  0x29   : > { %v396_v15 = vld [vmem:[#allocation2 + $0x1a0] sm:$0xff]  ;;  %1112 = vmatprep.subr.bf16.mxu1 %v1443_v12  ;;  %v1437_v31 = vcombine.high %v393_v24, %v397_v25  ;;  %v385_v33 = vld [vmem:[#allocation2 + $0x148] sm:$0xff]  ;;  %v1436_v38 = vcombine.low %v393_v24, %v397_v25  ;;  %s1299_s12 = sshll.u32 %s232_s10, 4  ;;  %s1285_s22 = scalar_lea.sflag [#allocation4], %s230_s8  ;;  %s1803_s12 = int_to_ptr.vmem [resolvable:$true] %s1299_s12 }
  0x2a   : > { %s237_s17 = scalar_lea.vmem %s1842_s0, %s1520_s14  ;;  %v1435_v18 = vcombine.high %v392_v14, %v396_v15  ;;  %v384_v19 = vld [vmem:[#allocation2 + $0x140] sm:$0xff]  ;;  %333 = vperm.xlu0 %1574, %v330_v11   ;;  %1113 = vmatpush1.bf16.msra.mxu1 %v1442_v13  ;;  %v1434_v23 = vcombine.low %v392_v14, %v396_v15  ;;  %v389_v34 = vld [vmem:[#allocation2 + $0x168] sm:$0xff]  ;;  %s1609_s16 = scalar_lea.vmem %s1803_s12, 1024 }
  0x2b   : > { %v244_v1 = vld [vmem:[%s237_s17 + $0x20] sm:$0x33]  ;;  %v1577_v4 = vld [vmem:[%s237_s17 + $0x14] ss:$8 sps:$4 sm:$0xff]   ;;  %v1579_v6 = vld [vmem:[%s237_s17 + $0x10] ss:$8 sps:$4 sm:$0xff]   ;;  %v1429_v39 = vcombine.high %v385_v33, %v389_v34  ;;  %v1428_v46 = vcombine.low %v385_v33, %v389_v34  ;;  %p1610_p6 = scmp.ne.s32.totalorder %s1803_s12, %s1609_s16 }
  0x2c   : > { %v1383_v2 = vcombine.high %v244_v1, %v244_v1  ;;  %v1382_v3 = vcombine.low %v244_v1, %v244_v1  ;;  %v1580_v8 = vld [vmem:[%s237_s17 + $0x4] ss:$8 sps:$4 sm:$0xff]   ;;  %v1582_v21 = vld [vmem:[%s237_s17] ss:$8 sps:$4 sm:$0xff]   ;;  %1114 = vmatprep.subr.bf16.mxu1 %v1435_v18  ;;  %s1679_s17 = smov [#allocation5]  }
  0x2d   : > { %v388_v20 = vld [vmem:[#allocation2 + $0x160] sm:$0xff]  ;;  %v377_v41 = vld [vmem:[#allocation2 + $0x108] sm:$0xff]  ;;  %p1611_p9 = pnand %p1610_p6, %p1748_p5  ;;  %s1613_s23 = sshll.u32 %s1679_s17, 4  ;;  %s1614_s23 = int_to_ptr.vmem [resolvable:$false] %s1613_s23 }
  0x2e   : > { %1384 = vmatprep.subr.msk.bf16.mxu0 %vm274_vm0, %v1383_v2  ;;  %v276_v5 = vsel %vm274_vm0, %v1382_v3, 0  ;;  %v1427_v26 = vcombine.high %v384_v19, %v388_v20  ;;  %v376_v27 = vld [vmem:[#allocation2 + $0x100] sm:$0xff]  ;;  %1115 = vmatpush1.bf16.msra.mxu1 %v1434_v23  ;;  %v1426_v32 = vcombine.low %v384_v19, %v388_v20  ;;  %v381_v42 = vld [vmem:[#allocation2 + $0x128] sm:$0xff]  ;;  %s1615_s25 = scalar_lea.vmem %s1614_s23, 2048  ;;  %p1616_p11 = scmp.lt.s32.totalorder %s1803_s12, %s1614_s23 }
  0x2f   : > { %292 = vmatpush1.bf16.msra.mxu0 %v276_v5  ;;  %v380_v28 = vld [vmem:[#allocation2 + $0x120] sm:$0xff]  ;;  %v1421_v47 = vcombine.high %v377_v41, %v381_v42  ;;  %v369_v49 = vld [vmem:[#allocation2 + $0xc8] sm:$0xff]  ;;  %v1420_v54 = vcombine.low %v377_v41, %v381_v42  ;;  %p1612_p10 = pneg %p1611_p9  ;;  %p1617_p12 = scmp.lt.s32.totalorder %s1615_s25, %s1609_s16 }
  0x30   : > { %293 = vmatprep.subr.bf16.mxu0 %v1577_v4  ;;  %v239_v29 = vld [vmem:[%s1843_s1] sm:$0xf]  ;;  %1116 = vmatprep.subr.bf16.mxu1 %v1427_v26  ;;  %v1419_v35 = vcombine.high %v376_v27, %v380_v28  ;;  %v1418_v40 = vcombine.low %v376_v27, %v380_v28  ;;  %v373_v50 = vld [vmem:[#allocation2 + $0xe8] sm:$0xff] }
  0x31   : > { %v368_v36 = vld [vmem:[#allocation2 + $0xc0] sm:$0xff]  ;;  %v1413_v55 = vcombine.high %v369_v49, %v373_v50  ;;  %v361_v57 = vld [vmem:[#allocation2 + $0x88] sm:$0xff]  ;;  %v1412_v62 = vcombine.low %v369_v49, %v373_v50  ;;  %p1618_p13 = por %p1617_p12, %p1616_p11 }
  0x32   : > { %v372_v37 = vld [vmem:[#allocation2 + $0xe0] sm:$0xff]  ;;  %1117 = vmatpush1.bf16.msra.mxu1 %v1426_v32  ;;  %v365_v58 = vld [vmem:[#allocation2 + $0xa8] sm:$0xff] }
  0x33   : > { %294 = vmatpush1.bf16.msra.mxu0 %v1579_v6  ;;  %1118 = vmatprep.subr.bf16.mxu1 %v1419_v35  ;;  %v1411_v43 = vcombine.high %v368_v36, %v372_v37  ;;  %v360_v44 = vld [vmem:[#allocation2 + $0x80] sm:$0xff]  ;;  %v1410_v48 = vcombine.low %v368_v36, %v372_v37  ;;  %v1405_v63 = vcombine.high %v361_v57, %v365_v58  ;;  %v353_v1 = vld [vmem:[#allocation2 + $0x48] sm:$0xff]  ;;  %p1619_p0 = pnand %p1618_p13, %p1612_p10 }
  0x34   : > { %295 = vmatprep.subr.bf16.mxu0 %v1580_v8  ;;  %v364_v45 = vld [vmem:[#allocation2 + $0xa0] sm:$0xff]  ;;  %v357_v2 = vld [vmem:[#allocation2 + $0x68] sm:$0xff]  ;;  %v1404_v6 = vcombine.low %v361_v57, %v365_v58 }
  0x35   : > { %v1403_v51 = vcombine.high %v360_v44, %v364_v45  ;;  %v352_v52 = vld [vmem:[#allocation2 + $0x40] sm:$0xff]  ;;  %v1402_v56 = vcombine.low %v360_v44, %v364_v45  ;;  %v1397_v7 = vcombine.high %v353_v1, %v357_v2  ;;  %v345_v9 = vld [vmem:[#allocation2 + $0x8] sm:$0xff]  ;;  %v1396_v14 = vcombine.low %v353_v1, %v357_v2 }
  0x36   : > { %1119 = vmatpush1.bf16.msra.mxu1 %v1418_v40  ;;  %v356_v53 = vld [vmem:[#allocation2 + $0x60] sm:$0xff]  ;;  %v349_v10 = vld [vmem:[#allocation2 + $0x28] sm:$0xff] }
  0x37   : > { %296 = vmatpush1.bf16.msra.mxu0 %v1582_v21  ;;  %1120 = vmatprep.subr.bf16.mxu1 %v1411_v43  ;;  %v1395_v59 = vcombine.high %v352_v52, %v356_v53  ;;  %v344_v60 = vld [vmem:[#allocation2] sm:$0xff]  ;;  %v1394_v0 = vcombine.low %v352_v52, %v356_v53  ;;  %v1389_v15 = vcombine.high %v345_v9, %v349_v10  ;;  %v465_v17 = vld [vmem:[#allocation2 + $0x3c8] sm:$0xff] }
  0x38   : > { %1153 = vmatprep.subr.bf16.mxu0 %v1445_v22  ;;  %v348_v61 = vld [vmem:[#allocation2 + $0x20] sm:$0xff]  ;;  %v469_v18 = vld [vmem:[#allocation2 + $0x3e8] sm:$0xff]  ;;  %v1388_v22 = vcombine.low %v345_v9, %v349_v10 }
  0x39   : > { %v1387_v3 = vcombine.high %v344_v60, %v348_v61  ;;  %v464_v4 = vld [vmem:[#allocation2 + $0x3c0] sm:$0xff]  ;;  %v1386_v8 = vcombine.low %v344_v60, %v348_v61  ;;  %v1509_v23 = vcombine.high %v465_v17, %v469_v18  ;;  %v457_v25 = vld [vmem:[#allocation2 + $0x388] sm:$0xff] }
  0x3a   : > { %1385 = vmatmul.mubr.msk.bf16.vlgmr.msra.gmra.mxu0 %vm270_vm1, %v239_v29  ;;  %1121 = vmatpush1.bf16.msra.mxu1 %v1410_v48  ;;  %v468_v5 = vld [vmem:[#allocation2 + $0x3e0] sm:$0xff]  ;;  %v461_v26 = vld [vmem:[#allocation2 + $0x3a8] sm:$0xff] }
  0x3b   : > { %1154 = vmatpush1.bf16.msra.mxu0 %v1444_v30  ;;  %1122 = vmatprep.subr.bf16.mxu1 %v1403_v51  ;;  %v1507_v11 = vcombine.high %v464_v4, %v468_v5  ;;  %v456_v12 = vld [vmem:[#allocation2 + $0x380] sm:$0xff]  ;;  %v1506_v16 = vcombine.low %v464_v4, %v468_v5  ;;  %v1508_v30 = vcombine.low %v465_v17, %v469_v18  ;;  %v449_v33 = vld [vmem:[#allocation2 + $0x348] sm:$0xff] }
  0x3c   : > { %1155 = vmatprep.subr.bf16.mxu0 %v1437_v31  ;;  %v460_v13 = vld [vmem:[#allocation2 + $0x3a0] sm:$0xff]  ;;  %v1501_v31 = vcombine.high %v457_v25, %v461_v26  ;;  %v453_v34 = vld [vmem:[#allocation2 + $0x368] sm:$0xff] }
  0x3d   : > { %v1499_v19 = vcombine.high %v456_v12, %v460_v13  ;;  %v448_v20 = vld [vmem:[#allocation2 + $0x340] sm:$0xff]  ;;  %v1498_v24 = vcombine.low %v456_v12, %v460_v13  ;;  %v441_v41 = vld [vmem:[#allocation2 + $0x308] sm:$0xff]  ;;  %v1492_v44 = vcombine.low %v449_v33, %v453_v34  ;;  %v402_v12 = vld [vmem:[#allocation2 + $0x1d0] sm:$0xff] }
  0x3e   : > { %1123 = vmatpush1.bf16.msra.mxu1 %v1402_v56  ;;  %v452_v21 = vld [vmem:[#allocation2 + $0x360] sm:$0xff]  ;;  %v445_v42 = vld [vmem:[#allocation2 + $0x328] sm:$0xff]  ;;  %v406_v13 = vld [vmem:[#allocation2 + $0x1f0] sm:$0xff] }
  0x3f   : > { %1156 = vmatpush1.bf16.msra.mxu0 %v1436_v38  ;;  %1124 = vmatprep.subr.bf16.mxu1 %v1395_v59  ;;  %v1491_v27 = vcombine.high %v448_v20, %v452_v21  ;;  %v440_v28 = vld [vmem:[#allocation2 + $0x300] sm:$0xff]  ;;  %v1490_v32 = vcombine.low %v448_v20, %v452_v21  ;;  %v1500_v38 = vcombine.low %v457_v25, %v461_v26  ;;  %v437_v48 = vld [vmem:[#allocation2 + $0x2e8] sm:$0xff] }
  0x40   : > { %1157 = vmatprep.subr.bf16.mxu0 %v1429_v39  ;;  %v444_v29 = vld [vmem:[#allocation2 + $0x320] sm:$0xff]  ;;  %v1493_v39 = vcombine.high %v449_v33, %v453_v34  ;;  %v1485_v45 = vcombine.high %v441_v41, %v445_v42  ;;  %v1484_v49 = vcombine.low %v441_v41, %v445_v42  ;;  %v429_v56 = vld [vmem:[#allocation2 + $0x2a8] sm:$0xff]  ;;  %v1446_v17 = vcombine.low %v402_v12, %v406_v13  ;;  %v394_v34 = vld [vmem:[#allocation2 + $0x190] sm:$0xff] }
  0x41   : > { %v1483_v35 = vcombine.high %v440_v28, %v444_v29  ;;  %v432_v36 = vld [vmem:[#allocation2 + $0x2c0] sm:$0xff]  ;;  %v1482_v40 = vcombine.low %v440_v28, %v444_v29 }
  0x42   : > { %1125 = vmatpush1.bf16.msra.mxu1 %v1394_v0  ;;  %v436_v37 = vld [vmem:[#allocation2 + $0x2e0] sm:$0xff]  ;;  %v421_v0 = vld [vmem:[#allocation2 + $0x268] sm:$0xff] }
  0x43   : > { %1158 = vmatpush1.bf16.msra.mxu0 %v1428_v46  ;;  %1126 = vmatprep.subr.bf16.mxu1 %v1387_v3  ;;  %v1475_v43 = vcombine.high %v432_v36, %v436_v37  ;;  %v1474_v46 = vcombine.low %v432_v36, %v436_v37  ;;  %v424_v52 = vld [vmem:[#allocation2 + $0x280] sm:$0xff]  ;;  %v395_v36 = vld [vmem:[#allocation2 + $0x198] sm:$0xff] }
  0x44   : > { %1159 = vmatprep.subr.bf16.mxu0 %v1421_v47  ;;  %v433_v47 = vld [vmem:[#allocation2 + $0x2c8] sm:$0xff]  ;;  %v428_v53 = vld [vmem:[#allocation2 + $0x2a0] sm:$0xff]  ;;  %v399_v37 = vld [vmem:[#allocation2 + $0x1b8] sm:$0xff] }
  0x45   : > { %v1477_v50 = vcombine.high %v433_v47, %v437_v48  ;;  %v1476_v51 = vcombine.low %v433_v47, %v437_v48  ;;  %v1466_v59 = vcombine.low %v424_v52, %v428_v53  ;;  %v416_v60 = vld [vmem:[#allocation2 + $0x240] sm:$0xff]  ;;  %v1441_v42 = vcombine.high %v395_v36, %v399_v37 }
  0x46   : > { %1127 = vmatpush1.bf16.msra.mxu1 %v1386_v8  ;;  %v420_v61 = vld [vmem:[#allocation2 + $0x260] sm:$0xff]  ;;  %v413_v8 = vld [vmem:[#allocation2 + $0x228] sm:$0xff]  ;;  %v1440_v47 = vcombine.low %v395_v36, %v399_v37  ;;  %v459_v36 = vld [vmem:[#allocation2 + $0x398] sm:$0xff] }
  0x47   : > { %1160 = vmatpush1.bf16.msra.mxu0 %v1420_v54  ;;  %1128 = vmatprep.subr.bf16.mxu1 %v1507_v11  ;;  %v425_v54 = vld [vmem:[#allocation2 + $0x288] sm:$0xff]  ;;  %v1458_v3 = vcombine.low %v416_v60, %v420_v61  ;;  %v408_v4 = vld [vmem:[#allocation2 + $0x200] sm:$0xff]  ;;  %v463_v37 = vld [vmem:[#allocation2 + $0x3b8] sm:$0xff] }
  0x48   : > { %1161 = vmatprep.subr.bf16.mxu0 %v1413_v55  ;;  %v1467_v55 = vcombine.high %v424_v52, %v428_v53  ;;  %v1468_v57 = vcombine.low %v425_v54, %v429_v56  ;;  %v1469_v58 = vcombine.high %v425_v54, %v429_v56  ;;  %v412_v5 = vld [vmem:[#allocation2 + $0x220] sm:$0xff]  ;;  %v379_v52 = vld [vmem:[#allocation2 + $0x118] sm:$0xff] }
  0x49   : > { %v1450_v11 = vcombine.low %v408_v4, %v412_v5  ;;  %v383_v53 = vld [vmem:[#allocation2 + $0x138] sm:$0xff] }
  0x4a   : > { %1129 = vmatpush2.bf16.msra.mxu1 %v1506_v16  ;;  %v407_v16 = vld [vmem:[#allocation2 + $0x1f8] sm:$0xff] }
  0x4b   : > { %1162 = vmatpush1.bf16.msra.mxu0 %v1412_v62  ;;  %1130 = vmatprep.subr.bf16.mxu1 %v1499_v19  ;;  %v417_v62 = vld [vmem:[#allocation2 + $0x248] sm:$0xff] }
  0x4c   : > { %1163 = vmatprep.subr.bf16.mxu0 %v1405_v63  ;;  %v1459_v63 = vcombine.high %v416_v60, %v420_v61  ;;  %v1460_v1 = vcombine.low %v417_v62, %v421_v0  ;;  %v1461_v2 = vcombine.high %v417_v62, %v421_v0  ;;  %v371_v60 = vld [vmem:[#allocation2 + $0xd8] sm:$0xff] }
  0x4d   : > { %v375_v61 = vld [vmem:[#allocation2 + $0xf8] sm:$0xff] }
  0x4e   : > { %1131 = vmatpush2.bf16.msra.mxu1 %v1498_v24 }
  0x4f   : > { %1164 = vmatpush1.bf16.msra.mxu0 %v1404_v6  ;;  %1132 = vmatprep.subr.bf16.mxu1 %v1491_v27  ;;  %v409_v6 = vld [vmem:[#allocation2 + $0x208] sm:$0xff] }
  0x50   : > { %1165 = vmatprep.subr.bf16.mxu0 %v1397_v7  ;;  %v1451_v7 = vcombine.high %v408_v4, %v412_v5  ;;  %v1452_v9 = vcombine.low %v409_v6, %v413_v8  ;;  %v1453_v10 = vcombine.high %v409_v6, %v413_v8  ;;  %v363_v4 = vld [vmem:[#allocation2 + $0x98] sm:$0xff] }
  0x51   : > { %v367_v5 = vld [vmem:[#allocation2 + $0xb8] sm:$0xff] }
  0x52   : > { %1133 = vmatpush2.bf16.msra.mxu1 %v1490_v32 }
  0x53   : > { %1166 = vmatpush1.bf16.msra.mxu0 %v1396_v14  ;;  %1134 = vmatprep.subr.bf16.mxu1 %v1483_v35  ;;  %v403_v14 = vld [vmem:[#allocation2 + $0x1d8] sm:$0xff]  ;;  %v398_v35 = vld [vmem:[#allocation2 + $0x1b0] sm:$0xff] }
  0x54   : > { %1167 = vmatprep.subr.bf16.mxu0 %v1389_v15  ;;  %v1447_v15 = vcombine.high %v402_v12, %v406_v13  ;;  %v1448_v18 = vcombine.low %v403_v14, %v407_v16  ;;  %v1449_v19 = vcombine.high %v403_v14, %v407_v16  ;;  %v1439_v41 = vcombine.high %v394_v34, %v398_v35  ;;  %v355_v12 = vld [vmem:[#allocation2 + $0x58] sm:$0xff] }
  0x55   : > { %v359_v13 = vld [vmem:[#allocation2 + $0x78] sm:$0xff] }
  0x56   : > { %1135 = vmatpush2.bf16.msra.mxu1 %v1482_v40  ;;  %v386_v40 = vld [vmem:[#allocation2 + $0x150] sm:$0xff] }
  0x57   : > { %1168 = vmatpush1.bf16.msra.mxu0 %v1388_v22  ;;  %1136 = vmatprep.subr.bf16.mxu1 %v1475_v43  ;;  %v390_v43 = vld [vmem:[#allocation2 + $0x170] sm:$0xff] }
  0x58   : > { %1169 = vmatprep.subr.bf16.mxu0 %v1509_v23  ;;  %v1431_v48 = vcombine.high %v386_v40, %v390_v43  ;;  %v1430_v54 = vcombine.low %v386_v40, %v390_v43  ;;  %v450_v43 = vld [vmem:[#allocation2 + $0x350] sm:$0xff] }
  0x5a   : > { %1137 = vmatpush2.bf16.msra.mxu1 %v1474_v46  ;;  %v1438_v46 = vcombine.low %v394_v34, %v398_v35  ;;  %v458_v34 = vld [vmem:[#allocation2 + $0x390] sm:$0xff] }
  0x5b   : > { %1170 = vmatpush2.bf16.msra.mxu0 %v1508_v30  ;;  %1138 = vmatprep.subr.bf16.mxu1 %v1467_v55  ;;  %v462_v35 = vld [vmem:[#allocation2 + $0x3b0] sm:$0xff] }
  0x5c   : > { %1171 = vmatprep.subr.bf16.mxu0 %v1501_v31 }
  0x5e   : > { %1139 = vmatpush2.bf16.msra.mxu1 %v1466_v59  ;;  %v374_v59 = vld [vmem:[#allocation2 + $0xf0] sm:$0xff] }
  0x5f   : > { %1172 = vmatpush2.bf16.msra.mxu0 %v1500_v38  ;;  %1140 = vmatprep.subr.bf16.mxu1 %v1459_v63  ;;  %v1424_v63 = vcombine.low %v379_v52, %v383_v53 }
  0x60   : > { %1173 = vmatprep.subr.bf16.mxu0 %v1493_v39 }
  0x62   : > { %1141 = vmatpush2.bf16.msra.mxu1 %v1458_v3  ;;  %v366_v3 = vld [vmem:[#allocation2 + $0xb0] sm:$0xff] }
  0x63   : > { %1174 = vmatpush2.bf16.msra.mxu0 %v1492_v44  ;;  %1142 = vmatprep.subr.bf16.mxu1 %v1451_v7  ;;  %v387_v44 = vld [vmem:[#allocation2 + $0x158] sm:$0xff]  ;;  %v1416_v7 = vcombine.low %v371_v60, %v375_v61 }
  0x64   : > { %1175 = vmatprep.subr.bf16.mxu0 %v1485_v45  ;;  %v391_v45 = vld [vmem:[#allocation2 + $0x178] sm:$0xff] }
  0x65   : > { %v1432_v55 = vcombine.low %v387_v44, %v391_v45 }
  0x66   : > { %1143 = vmatpush2.bf16.msra.mxu1 %v1450_v11  ;;  %v358_v11 = vld [vmem:[#allocation2 + $0x70] sm:$0xff] }
  0x67   : > { %1176 = vmatpush2.bf16.msra.mxu0 %v1484_v49  ;;  %1194 = vmatprep.subr.bf16.mxu1 %v1447_v15  ;;  %v1433_v49 = vcombine.high %v387_v44, %v391_v45  ;;  %v1408_v15 = vcombine.low %v363_v4, %v367_v5  ;;  %v454_v44 = vld [vmem:[#allocation2 + $0x370] sm:$0xff]  ;;  %v451_v45 = vld [vmem:[#allocation2 + $0x358] sm:$0xff] }
  0x68   : > { %1177 = vmatprep.subr.bf16.mxu0 %v1477_v50  ;;  %v378_v50 = vld [vmem:[#allocation2 + $0x110] sm:$0xff] }
  0x6b   : > { %1178 = vmatpush2.bf16.msra.mxu0 %v1476_v51  ;;  %v382_v51 = vld [vmem:[#allocation2 + $0x130] sm:$0xff] }
  0x6c   : > { %1179 = vmatprep.subr.bf16.mxu0 %v1469_v58  ;;  %v1423_v56 = vcombine.high %v378_v50, %v382_v51  ;;  %v370_v58 = vld [vmem:[#allocation2 + $0xd0] sm:$0xff]  ;;  %v1422_v62 = vcombine.low %v378_v50, %v382_v51 }
  0x6d   : > { %v1415_v0 = vcombine.high %v370_v58, %v374_v59  ;;  %v1414_v6 = vcombine.low %v370_v58, %v374_v59  ;;  %v442_v51 = vld [vmem:[#allocation2 + $0x310] sm:$0xff] }
  0x6e   : > { %v434_v59 = vld [vmem:[#allocation2 + $0x2d0] sm:$0xff] }
  0x6f   : > { %1180 = vmatpush2.bf16.msra.mxu0 %v1468_v57  ;;  %v1425_v57 = vcombine.high %v379_v52, %v383_v53  ;;  %v446_v52 = vld [vmem:[#allocation2 + $0x330] sm:$0xff]  ;;  %v443_v53 = vld [vmem:[#allocation2 + $0x318] sm:$0xff] }
  0x70   : > { %1181 = vmatprep.subr.bf16.mxu0 %v1461_v2  ;;  %v362_v2 = vld [vmem:[#allocation2 + $0x90] sm:$0xff] }
  0x71   : > { %v1407_v8 = vcombine.high %v362_v2, %v366_v3  ;;  %v1406_v14 = vcombine.low %v362_v2, %v366_v3  ;;  %v426_v3 = vld [vmem:[#allocation2 + $0x290] sm:$0xff] }
  0x73   : > { %1182 = vmatpush2.bf16.msra.mxu0 %v1460_v1  ;;  %v1417_v1 = vcombine.high %v371_v60, %v375_v61  ;;  %v438_v60 = vld [vmem:[#allocation2 + $0x2f0] sm:$0xff]  ;;  %v435_v61 = vld [vmem:[#allocation2 + $0x2d8] sm:$0xff] }
  0x74   : > { %1183 = vmatprep.subr.bf16.mxu0 %v1453_v10  ;;  %v354_v10 = vld [vmem:[#allocation2 + $0x50] sm:$0xff] }
  0x75   : > { %v1399_v16 = vcombine.high %v354_v10, %v358_v11 }
  0x77   : > { %1184 = vmatpush2.bf16.msra.mxu0 %v1452_v9  ;;  %v1409_v9 = vcombine.high %v363_v4, %v367_v5  ;;  %v430_v4 = vld [vmem:[#allocation2 + $0x2b0] sm:$0xff]  ;;  %v427_v5 = vld [vmem:[#allocation2 + $0x298] sm:$0xff] }
  0x78   : > { %1235 = vmatprep.subr.bf16.mxu0 %v1449_v19  ;;  %v350_v19 = vld [vmem:[#allocation2 + $0x30] sm:$0xff] }
  0xa1   : > { %v326_v20 = vpop.permute.xlu0 %325 }
  0xa5   : > { %v334_v23 = vpop.permute.xlu0 %333 }
  0xfa   : > { %v315_v21 = vpop.f32.mrf.mxu0 }
  0xfb   : > { %v328_v22 = vmul.f32 %v326_v20, %v315_v21  ;;  %v351_v21 = vld [vmem:[#allocation2 + $0x38] sm:$0xff] }
  0xfc   : > { %v317_v24 = vpop.f32.mrf.mxu0 }
  0xfd   : > { %v336_v25 = vadd.f32 %v334_v23, %v328_v22  ;;  %v329_v26 = vmul.f32 %v326_v20, %v317_v24  ;;  %v347_v20 = vld [vmem:[#allocation2 + $0x18] sm:$0xff]  ;;  %v1398_v22 = vcombine.low %v354_v10, %v358_v11  ;;  %v418_v11 = vld [vmem:[#allocation2 + $0x250] sm:$0xff] }
  0xfe   : > { %v319_v27 = vpop.f32.mrf.mxu0 }
  0xff   : > { %v338_v28 = vmul.f32 0.1, %v336_v25  ;;  %v337_v29 = vadd.f32 %v334_v23, %v329_v26  ;;  %v1400_v23 = vcombine.low %v355_v12, %v359_v13  ;;  %v466_v26 = vld [vmem:[#allocation2 + $0x3d0] sm:$0xff] }
 0x100   : > { %v320_v30 = vpop.f32.mrf.mxu0  ;;  %v470_v27 = vld [vmem:[#allocation2 + $0x3f0] sm:$0xff] }
 0x101   : > { %v339_v31 = vmul.f32 0.1, %v337_v29  ;;  %v340_v32 = vmax.f32 %v336_v25, %v338_v28  ;;  %v1393_v25 = vcombine.high %v347_v20, %v351_v21  ;;  %v467_v28 = vld [vmem:[#allocation2 + $0x3d8] sm:$0xff] }
 0x103   : > { %v341_v33 = vmax.f32 %v337_v29, %v339_v31  ;;  %v1790_v39 = vpack.c.bf16 %v340_v32, %v340_v32  ;;  %v471_v29 = vld [vmem:[#allocation2 + $0x3f8] sm:$0xff]  ;;  %v1392_v31 = vcombine.low %v347_v20, %v351_v21  ;;  %v1511_v32 = vcombine.high %v466_v26, %v470_v27  ;;  %v414_v20 = vld [vmem:[#allocation2 + $0x230] sm:$0xff] }
 0x104   : > { %v1512_v40 = vcombine.low %v467_v28, %v471_v29  ;;  %v411_v21 = vld [vmem:[#allocation2 + $0x218] sm:$0xff] }
 0x105   : > { %v343_v38 = vpack.c.bf16 %v341_v33, %v341_v33  ;;  %v1513_v33 = vcombine.high %v467_v28, %v471_v29 }
 0x107   : > { %1144 = vmatprep.mubr.bf16.mxu1 %v343_v38  ;;  %1185 = vmatprep.mubr.bf16.mxu0 %v343_v38 }
 0x108   : > { %1145 = vmatmul.mubr.bf16.vlgmr.msra.gmra.mxu1 %v1790_v39  ;;  %1186 = vmatmul.mubr.bf16.vlgmr.msra.gmra.mxu0 %v1790_v39 }
 0x109   : > { %1195 = vmatpush1.bf16.msra.mxu1 %v1446_v17  ;;  %1236 = vmatpush1.bf16.msra.mxu0 %v1448_v18  ;;  %v1401_v17 = vcombine.high %v355_v12, %v359_v13  ;;  %v346_v18 = vld [vmem:[#allocation2 + $0x10] sm:$0xff]  ;;  %v419_v13 = vld [vmem:[#allocation2 + $0x258] sm:$0xff] }
 0x10a   : > { %1226 = vmatprep.mubr.bf16.mxu1 %v343_v38  ;;  %1267 = vmatprep.mubr.bf16.mxu0 %v343_v38  ;;  %v1391_v24 = vcombine.high %v346_v18, %v350_v19  ;;  %v1390_v30 = vcombine.low %v346_v18, %v350_v19  ;;  %v1510_v38 = vcombine.low %v466_v26, %v470_v27  ;;  %v422_v12 = vld [vmem:[#allocation2 + $0x270] sm:$0xff] }
 0x10b   : > { %1196 = vmatprep.subr.bf16.mxu1 %v1439_v41  ;;  %1237 = vmatprep.subr.bf16.mxu0 %v1441_v42  ;;  %v1503_v41 = vcombine.high %v458_v34, %v462_v35  ;;  %v1505_v42 = vcombine.high %v459_v36, %v463_v37  ;;  %v410_v19 = vld [vmem:[#allocation2 + $0x210] sm:$0xff] }
 0x10c   : > { %v1454_v27 = vcombine.low %v410_v19, %v414_v20 }
 0x10d   : > { %1197 = vmatpush1.bf16.msra.mxu1 %v1438_v46  ;;  %1238 = vmatpush1.bf16.msra.mxu0 %v1440_v47  ;;  %v455_v46 = vld [vmem:[#allocation2 + $0x378] sm:$0xff]  ;;  %v1502_v47 = vcombine.low %v458_v34, %v462_v35 }
 0x10e   : > { %1198 = vmatprep.subr.bf16.mxu1 %v1431_v48  ;;  %1239 = vmatprep.subr.bf16.mxu0 %v1433_v49  ;;  %v1504_v48 = vcombine.low %v459_v36, %v463_v37  ;;  %v1495_v49 = vcombine.high %v450_v43, %v454_v44  ;;  %v1497_v50 = vcombine.high %v451_v45, %v455_v46 }
 0x111   : > { %1199 = vmatpush1.bf16.msra.mxu1 %v1430_v54  ;;  %1240 = vmatpush1.bf16.msra.mxu0 %v1432_v55  ;;  %v447_v54 = vld [vmem:[#allocation2 + $0x338] sm:$0xff]  ;;  %v1494_v55 = vcombine.low %v450_v43, %v454_v44 }
 0x112   : > { %1200 = vmatprep.subr.bf16.mxu1 %v1423_v56  ;;  %1241 = vmatprep.subr.bf16.mxu0 %v1425_v57  ;;  %v1496_v56 = vcombine.low %v451_v45, %v455_v46  ;;  %v1487_v57 = vcombine.high %v442_v51, %v446_v52  ;;  %v1489_v58 = vcombine.high %v443_v53, %v447_v54 }
 0x115   : > { %1201 = vmatpush1.bf16.msra.mxu1 %v1422_v62  ;;  %1242 = vmatpush1.bf16.msra.mxu0 %v1424_v63  ;;  %v439_v62 = vld [vmem:[#allocation2 + $0x2f8] sm:$0xff]  ;;  %v1486_v63 = vcombine.low %v442_v51, %v446_v52 }
 0x116   : > { %1202 = vmatprep.subr.bf16.mxu1 %v1415_v0  ;;  %1243 = vmatprep.subr.bf16.mxu0 %v1417_v1  ;;  %v1488_v0 = vcombine.low %v443_v53, %v447_v54  ;;  %v1479_v1 = vcombine.high %v434_v59, %v438_v60  ;;  %v1481_v2 = vcombine.high %v435_v61, %v439_v62 }
 0x119   : > { %1203 = vmatpush1.bf16.msra.mxu1 %v1414_v6  ;;  %1244 = vmatpush1.bf16.msra.mxu0 %v1416_v7  ;;  %v431_v6 = vld [vmem:[#allocation2 + $0x2b8] sm:$0xff]  ;;  %v1478_v7 = vcombine.low %v434_v59, %v438_v60 }
 0x11a   : > { %1204 = vmatprep.subr.bf16.mxu1 %v1407_v8  ;;  %1245 = vmatprep.subr.bf16.mxu0 %v1409_v9  ;;  %v1480_v8 = vcombine.low %v435_v61, %v439_v62  ;;  %v1471_v9 = vcombine.high %v426_v3, %v430_v4  ;;  %v1473_v10 = vcombine.high %v427_v5, %v431_v6 }
 0x11d   : > { %1205 = vmatpush1.bf16.msra.mxu1 %v1406_v14  ;;  %1246 = vmatpush1.bf16.msra.mxu0 %v1408_v15  ;;  %v423_v14 = vld [vmem:[#allocation2 + $0x278] sm:$0xff]  ;;  %v1470_v15 = vcombine.low %v426_v3, %v430_v4 }
 0x11e   : > { %1206 = vmatprep.subr.bf16.mxu1 %v1399_v16  ;;  %1247 = vmatprep.subr.bf16.mxu0 %v1401_v17  ;;  %v1472_v16 = vcombine.low %v427_v5, %v431_v6  ;;  %v1463_v17 = vcombine.high %v418_v11, %v422_v12  ;;  %v1465_v18 = vcombine.high %v419_v13, %v423_v14 }
 0x121   : > { %1207 = vmatpush1.bf16.msra.mxu1 %v1398_v22  ;;  %1248 = vmatpush1.bf16.msra.mxu0 %v1400_v23  ;;  %v415_v22 = vld [vmem:[#allocation2 + $0x238] sm:$0xff]  ;;  %v1462_v23 = vcombine.low %v418_v11, %v422_v12 }
 0x122   : > { %1208 = vmatprep.subr.bf16.mxu1 %v1391_v24  ;;  %1249 = vmatprep.subr.bf16.mxu0 %v1393_v25  ;;  %v1464_v24 = vcombine.low %v419_v13, %v423_v14  ;;  %v1455_v25 = vcombine.high %v410_v19, %v414_v20  ;;  %v1457_v26 = vcombine.high %v411_v21, %v415_v22 }
 0x123   : > { %v1456_v28 = vcombine.low %v411_v21, %v415_v22 }
 0x125   : > { %1209 = vmatpush1.bf16.msra.mxu1 %v1390_v30  ;;  %1250 = vmatpush1.bf16.msra.mxu0 %v1392_v31 }
 0x126   : > { %1210 = vmatprep.subr.bf16.mxu1 %v1511_v32  ;;  %1251 = vmatprep.subr.bf16.mxu0 %v1513_v33 }
 0x129   : > { %1211 = vmatpush2.bf16.msra.mxu1 %v1510_v38  ;;  %1252 = vmatpush2.bf16.msra.mxu0 %v1512_v40 }
 0x12a   : > { %1212 = vmatprep.subr.bf16.mxu1 %v1503_v41  ;;  %1253 = vmatprep.subr.bf16.mxu0 %v1505_v42 }
 0x12d   : > { %1213 = vmatpush2.bf16.msra.mxu1 %v1502_v47  ;;  %1254 = vmatpush2.bf16.msra.mxu0 %v1504_v48 }
 0x12e   : > { %1214 = vmatprep.subr.bf16.mxu1 %v1495_v49  ;;  %1255 = vmatprep.subr.bf16.mxu0 %v1497_v50 }
 0x131   : > { %1215 = vmatpush2.bf16.msra.mxu1 %v1494_v55  ;;  %1256 = vmatpush2.bf16.msra.mxu0 %v1496_v56 }
 0x132   : > { %1216 = vmatprep.subr.bf16.mxu1 %v1487_v57  ;;  %1257 = vmatprep.subr.bf16.mxu0 %v1489_v58 }
 0x135   : > { %1217 = vmatpush2.bf16.msra.mxu1 %v1486_v63  ;;  %1258 = vmatpush2.bf16.msra.mxu0 %v1488_v0 }
 0x136   : > { %1218 = vmatprep.subr.bf16.mxu1 %v1479_v1  ;;  %1259 = vmatprep.subr.bf16.mxu0 %v1481_v2 }
 0x139   : > { %1219 = vmatpush2.bf16.msra.mxu1 %v1478_v7  ;;  %1260 = vmatpush2.bf16.msra.mxu0 %v1480_v8 }
 0x13a   : > { %1220 = vmatprep.subr.bf16.mxu1 %v1471_v9  ;;  %1261 = vmatprep.subr.bf16.mxu0 %v1473_v10 }
 0x13d   : > { %1221 = vmatpush2.bf16.msra.mxu1 %v1470_v15  ;;  %1262 = vmatpush2.bf16.msra.mxu0 %v1472_v16 }
 0x13e   : > { %1222 = vmatprep.subr.bf16.mxu1 %v1463_v17  ;;  %1263 = vmatprep.subr.bf16.mxu0 %v1465_v18 }
 0x141   : > { %1223 = vmatpush2.bf16.msra.mxu1 %v1462_v23  ;;  %1264 = vmatpush2.bf16.msra.mxu0 %v1464_v24 }
 0x142   : > { %1224 = vmatprep.subr.bf16.mxu1 %v1455_v25  ;;  %1265 = vmatprep.subr.bf16.mxu0 %v1457_v26 }
 0x145   : > { %1225 = vmatpush2.bf16.msra.mxu1 %v1454_v27  ;;  %1266 = vmatpush2.bf16.msra.mxu0 %v1456_v28 }
 0x148   : > { %1227 = vmatmul.mubr.bf16.vlgmr.msra.gmra.mxu1 %v1790_v39  ;;  %1268 = vmatmul.mubr.bf16.vlgmr.msra.gmra.mxu0 %v1790_v39 }
 0x1c8   : > { %v1146_v29 = vpop.f32.mrf.mxu1  ;;  %v1187_v30 = vpop.f32.mrf.mxu0 }
 0x1c9   : > { %1276 = vst [vmem:[%s232_s10] sm:$0xff] %v1146_v29  ;;  %1278 = vst [vmem:[%s232_s10 + $0x10] sm:$0xff] %v1187_v30 }
 0x1ca   : > { %v1148_v31 = vpop.f32.mrf.mxu1  ;;  %v1189_v32 = vpop.f32.mrf.mxu0 }
 0x1cb   : > { %1277 = vst [vmem:[%s232_s10 + $0x8] sm:$0xff] %v1148_v31  ;;  %1279 = vst [vmem:[%s232_s10 + $0x18] sm:$0xff] %v1189_v32 }
 0x1cc   : > { %v1150_v33 = vpop.f32.mrf.mxu1  ;;  %v1191_v34 = vpop.f32.mrf.mxu0 }
 0x1ce   : > { %v1151_v35 = vpop.f32.mrf.mxu1  ;;  %v1192_v36 = vpop.f32.mrf.mxu0 }
 0x208   : > { %v1228_v39 = vpop.f32.mrf.mxu1  ;;  %v1269_v37 = vpop.f32.mrf.mxu0 }
 0x209   : > { %1280 = vst [vmem:[%s232_s10 + $0x20] sm:$0xff] %v1228_v39  ;;  %1282 = vst [vmem:[%s232_s10 + $0x30] sm:$0xff] %v1269_v37 }
 0x20a   : > { %v1230_v38 = vpop.f32.mrf.mxu1  ;;  %v1271_v40 = vpop.f32.mrf.mxu0 }
 0x20b   : > { %1281 = vst [vmem:[%s232_s10 + $0x28] sm:$0xff] %v1230_v38  ;;  %1283 = vst [vmem:[%s232_s10 + $0x38] sm:$0xff] %v1271_v40 }
 0x20c   : > { %v1232_v41 = vpop.f32.mrf.mxu1  ;;  %v1273_v42 = vpop.f32.mrf.mxu0 }
 0x20d   : > { %1622 = shalt.err (!%p1619_p0)
}
 0x20e   : > { %s1623_s26 = scalar_lea.hbm %s1801_s15, 1024  ;;  %s1627_s7 = scalar_lea.hbm %s1847_s5, 2048 }
 0x20f   : > { %p1624_p1 = scmp.ne.s32.totalorder %s1801_s15, %s1623_s26  ;;  %p1628_p4 = scmp.lt.s32.totalorder %s1801_s15, %s1847_s5 }
 0x210   : > { %p1629_p7 = scmp.lt.s32.totalorder %s1627_s7, %s1623_s26 }
 0x211   : > { %p1625_p2 = pnand %p1624_p1, %p1748_p5 }
 0x212   : > { %p1630_p8 = por %p1629_p7, %p1628_p4 }
 0x213   : > { %p1626_p3 = pneg %p1625_p2 }
 0x215   : > { %p1631_p6 = pnand %p1630_p8, %p1626_p3 }
 0x217   : > { %1634 = shalt.err (!%p1631_p6)
}
 0x218   : > { %1525 = dma.vmem_to_hbm [thread:$0]  (%p1748_p5), %s1803_s12, 1024, %s1801_s15, %s1285_s22   ;;  %v1233_v43 = vpop.f32.mrf.mxu1  ;;  %v1274_v44 = vpop.f32.mrf.mxu0 }
 0x219 PF: > { %p1537_p9 = scmp.ge.s32.totalorder %s1673_s21, 2  ;;  %s1311_s10 = sand.u32 1, %s1661_s18  }
 0x21a   : > { %p1851_p10 = scmp.ne.s32.totalorder %s1849_s29, 0  ;;  %s1312_s11 = scalar_lea.sflag [#allocation4], %s1311_s10 }
 0x21c   : > { %p1532_p11 = pnand %p1537_p9, %p1851_p10 }
 0x21e   : > { %p1533_p12 = pneg %p1532_p11 }
 0x220   : > { %1656 = dma.done.wait (%p1533_p12), %s1312_s11, 1024  }
 0x221   : > { %1658 = vsyncadd (%p1533_p12), %s1312_s11, 4294966272  ;;  %p16_p5 = scmp.ge.s32.totalorder %s1735_s24, 4   ;;  %s1852_s18 = smov %s1665_s19 }
 0x222   : > { %s1853_s19 = smov %s1669_s20  ;;  %s1854_s20 = smov %s1746_s27 }
 0x223   : > { %s1855_s21 = smov %s1735_s24  ;;  %18 = sbr.rel (!%p16_p5) target bundleno = 4 (0x4), region = 80 }
 0x228   :  { %1317 = vsyncpa [#allocation3], 1 }
 0x229   :  { %1319 = vsyncpa [#allocation3 + $0x1], 1 }
 0x22a   :  { %1320 = vsyncpa [#allocation4], 1 }
 0x22b   :  { %1322 = vsyncpa [#allocation4 + $0x1], 1 }

</bundles_post_ra>
